<compile_context>
chip_gen: v7x
topology: tpu7x:2x2x1
jax: 0.10.0
libtpu: 0.0.40
codegen_flags: <defaults>
</compile_context>

<pallas_src>
import functools

import jax
import jax.numpy as jnp
from jax.experimental import pallas as pl
from jax.experimental.pallas import tpu as pltpu


def vote_kernel(xyz_ref, feat_ref, w1t_ref, b1_ref, w2t_ref, b2_ref, out_ref,
                *, limits):
    # One batch element per grid step; channels on sublanes, N points on lanes.
    feat = feat_ref[0]                                                # (Cin, N)

    # Shared MLP: Conv1d(Cin->Cmid, k=1, no bias) + folded BN + ReLU.
    h = jnp.dot(w1t_ref[...], feat, preferred_element_type=jnp.float32)
    h = jnp.maximum(h + b1_ref[...], 0.0)                             # (Cmid, N)

    # Padded regression head: rows 0:3 and 3:6 are both ctr_reg, rows 6:8 zero.
    off8 = jnp.dot(w2t_ref[...], h, preferred_element_type=jnp.float32)
    off8 = off8 + b2_ref[...]                                         # (8, N)

    if limits is not None:
        lx, ly, lz = limits
        big = float("inf")                       # rows >= 3 are never clamped
        row = jax.lax.broadcasted_iota(jnp.int32, off8.shape, 0)
        lim = jnp.where(row == 0, lx,
              jnp.where(row == 1, ly,
              jnp.where(row == 2, lz, big))).astype(jnp.float32)
        clamped = jnp.where(off8 > lim, lim, off8)
        clamped = jnp.where(clamped < -lim, -lim, clamped)
    else:
        clamped = off8

    # xyz_ref rows 0:3 hold xyz^T, rows 3:8 are zero, so rows 3:6 of the output
    # stay equal to the raw (unclamped) ctr offsets.
    out_ref[0] = (xyz_ref[0] + clamped).astype(out_ref.dtype)


def vote_layer_forward(xyz, features_ncl, params, max_translate_range):
    """xyz: (B, N, 3) f32; features_ncl: (B, Cin, N) f32 (PyTorch NCL layout)."""
    B, N, _ = xyz.shape
    Cin = features_ncl.shape[1]
    eps = 1e-5

    # Fold inference-mode BatchNorm into the first conv's weight / bias.
    scale = params["bn_gamma"] * jax.lax.rsqrt(params["bn_var"] + eps)  # (Cmid,)
    w1t = (params["w1"] * scale[None, :]).T                             # (Cmid, Cin)
    Cmid = w1t.shape[0]
    b1 = (params["bn_beta"] - params["bn_mean"] * scale).reshape(Cmid, 1)

    # Pad the 3-channel ctr_reg head to 8 rows so the kernel writes one
    # lane-dense (8, N) slab per batch element.
    w2t = params["w2"].T                                                # (3, Cmid)
    w2t8 = jnp.concatenate(
        [w2t, w2t, jnp.zeros((2, Cmid), jnp.float32)], axis=0)          # (8, Cmid)
    b2 = params["b2"].reshape(3, 1)
    b28 = jnp.concatenate([b2, b2, jnp.zeros((2, 1), jnp.float32)], axis=0)

    # Only the tiny xyz tensor is transposed wrapper-side (3 channels, not Cin),
    # padded with zero rows so the raw-offset rows stay untouched.
    xyz8 = jnp.concatenate(
        [jnp.transpose(xyz, (0, 2, 1)).astype(jnp.float32),
         jnp.zeros((B, 5, N), jnp.float32)], axis=1)                    # (B, 8, N)

    limits = (tuple(float(v) for v in max_translate_range)
              if max_translate_range is not None else None)

    flops = 2 * B * N * Cmid * (Cin + 8)
    bytes_accessed = 4 * (B * N * (Cin + 8 + 8) + Cmid * (Cin + 1) + 8 * (Cmid + 1))

    slab = pl.pallas_call(
        functools.partial(vote_kernel, limits=limits),
        out_shape=jax.ShapeDtypeStruct((B, 8, N), jnp.float32),
        grid_spec=pltpu.PrefetchScalarGridSpec(
            num_scalar_prefetch=0,
            grid=(B,),
            in_specs=[
                pl.BlockSpec((1, 8, N), lambda b: (b, 0, 0)),     # xyz^T padded
                pl.BlockSpec((1, Cin, N), lambda b: (b, 0, 0)),   # features (NCL)
                pl.BlockSpec((Cmid, Cin), lambda b: (0, 0)),      # W1^T (BN folded)
                pl.BlockSpec((Cmid, 1), lambda b: (0, 0)),        # folded BN bias
                pl.BlockSpec((8, Cmid), lambda b: (0, 0)),        # W2^T padded
                pl.BlockSpec((8, 1), lambda b: (0, 0)),           # b2 padded
            ],
            out_specs=pl.BlockSpec((1, 8, N), lambda b: (b, 0, 0)),
        ),
        compiler_params=pltpu.CompilerParams(
            dimension_semantics=("parallel",)),
        cost_estimate=pl.CostEstimate(
            flops=flops, transcendentals=0, bytes_accessed=bytes_accessed),
    )(xyz8, features_ncl, w1t, b1, w2t8, b28)

    vote_xyz = jnp.transpose(slab[:, 0:3, :], (0, 2, 1)).astype(xyz.dtype)
    ctr_offsets = jnp.transpose(slab[:, 3:6, :], (0, 2, 1))
    # In the reference, new_features = ctr_offsets[..., 3:] which is an empty
    # (B, N, 0) tensor because ctr_reg only produces 3 channels.
    new_features = jnp.zeros((B, N, 0), dtype=jnp.float32)
    return vote_xyz, new_features, xyz, ctr_offsets


def _reference_forward(xyz, features_ncl, params, max_translate_range):
    """Pure-JAX reference matching the PyTorch forward (inference-mode BN)."""
    eps = 1e-5
    feats = jnp.transpose(features_ncl, (0, 2, 1))                    # (B, N, Cin)
    h = jnp.einsum("bnc,cm->bnm", feats, params["w1"])
    scale = params["bn_gamma"] / jnp.sqrt(params["bn_var"] + eps)
    h = (h - params["bn_mean"]) * scale + params["bn_beta"]
    h = jnp.maximum(h, 0.0)
    off = jnp.einsum("bnm,mo->bno", h, params["w2"]) + params["b2"]
    lim = jnp.asarray(max_translate_range, jnp.float32).reshape(1, 1, 3)
    limited = jnp.where(off > lim, lim, off)
    limited = jnp.where(limited < -lim, -lim, limited)
    return xyz + limited, off


if __name__ == "__main__":
    B, N = 2, 128
    pre_channel = 16
    mlp_list = [32]          # single shared-MLP layer (matches module quirk)
    Cmid = mlp_list[-1]
    max_translate_range = [3.0, 3.0, 2.0]

    key = jax.random.PRNGKey(0)
    k = jax.random.split(key, 8)
    params = {
        "w1": jax.random.normal(k[0], (pre_channel, Cmid), jnp.float32) * 0.1,
        "bn_gamma": jnp.ones((Cmid,), jnp.float32)
                    + 0.01 * jax.random.normal(k[1], (Cmid,), jnp.float32),
        "bn_beta": 0.01 * jax.random.normal(k[2], (Cmid,), jnp.float32),
        "bn_mean": 0.01 * jax.random.normal(k[3], (Cmid,), jnp.float32),
        "bn_var": jnp.ones((Cmid,), jnp.float32)
                  + 0.01 * jnp.abs(jax.random.normal(k[4], (Cmid,), jnp.float32)),
        "w2": jax.random.normal(k[5], (Cmid, 3), jnp.float32) * 0.1,
        "b2": 0.01 * jax.random.normal(k[6], (3,), jnp.float32),
    }

    xyz = jax.random.normal(k[7], (B, N, 3), jnp.float32) * 5.0
    features = jax.random.normal(key, (B, pre_channel, N), jnp.float32)

    vote_xyz, new_features, xyz_select, ctr_offsets = jax.block_until_ready(
        vote_layer_forward(xyz, features, params, max_translate_range))

    ref_vote, ref_off = _reference_forward(xyz, features, params,
                                           max_translate_range)
    assert vote_xyz.shape == (B, N, 3)
    assert new_features.shape == (B, N, 0)
    assert ctr_offsets.shape == (B, N, 3)
    assert jnp.allclose(vote_xyz, ref_vote, atol=1e-4, rtol=1e-4)
    assert jnp.allclose(ctr_offsets, ref_off, atol=1e-4, rtol=1e-4)
    print("KERNEL_OK")
</pallas_src>

<mosaic_0001>
module attributes {stable_mosaic.version = 11 : i64} {
  func.func @vote_kernel(%arg0: i32, %arg1: memref<1x8x128xf32, #tpu.memory_space<vmem>>, %arg2: memref<1x16x128xf32, #tpu.memory_space<vmem>>, %arg3: memref<32x16xf32, #tpu.memory_space<vmem>>, %arg4: memref<32x1xf32, #tpu.memory_space<vmem>>, %arg5: memref<8x32xf32, #tpu.memory_space<vmem>>, %arg6: memref<8x1xf32, #tpu.memory_space<vmem>>, %arg7: memref<1x8x128xf32, #tpu.memory_space<vmem>>) attributes {dimension_semantics = [#tpu.dimension_semantics<parallel>], iteration_bounds = array<i64: 2>, scalar_prefetch = 0 : i64, scratch_operands = 0 : i64, tpu.core_type = #tpu.core_type<tc>, window_params = [{transform_indices = @transform_0, window_bounds = array<i64: 1, 8, 128>}, {transform_indices = @transform_1, window_bounds = array<i64: 1, 16, 128>}, {pipeline_mode = #tpu.pipeline_mode<synchronous>, transform_indices = @transform_2, window_bounds = array<i64: 32, 16>}, {pipeline_mode = #tpu.pipeline_mode<synchronous>, transform_indices = @transform_3, window_bounds = array<i64: 32, 1>}, {pipeline_mode = #tpu.pipeline_mode<synchronous>, transform_indices = @transform_4, window_bounds = array<i64: 8, 32>}, {pipeline_mode = #tpu.pipeline_mode<synchronous>, transform_indices = @transform_5, window_bounds = array<i64: 8, 1>}, {transform_indices = @transform_6, window_bounds = array<i64: 1, 8, 128>}]} {
    %c0 = arith.constant 0 : index
    %c0_0 = arith.constant 0 : index
    %c0_1 = arith.constant 0 : index
    %0 = vector.load %arg2[%c0, %c0_0, %c0_1] : memref<1x16x128xf32, #tpu.memory_space<vmem>>, vector<1x16x128xf32>
    %1 = vector.shape_cast %0 : vector<1x16x128xf32> to vector<16x128xf32>
    %c0_2 = arith.constant 0 : index
    %c0_3 = arith.constant 0 : index
    %2 = vector.load %arg3[%c0_2, %c0_3] : memref<32x16xf32, #tpu.memory_space<vmem>>, vector<32x16xf32>
    %cst = arith.constant dense<0.000000e+00> : vector<32x128xf32>
    %3 = tpu.matmul %2, %1, %cst {dimension_numbers = #tpu.dot_dimension_numbers<[1], [0], [0], [1], [0, 0, 1, 1], [], []>} : vector<32x16xf32>, vector<16x128xf32>, vector<32x128xf32> -> vector<32x128xf32>
    %c0_4 = arith.constant 0 : index
    %c0_5 = arith.constant 0 : index
    %4 = vector.load %arg4[%c0_4, %c0_5] : memref<32x1xf32, #tpu.memory_space<vmem>>, vector<32x1xf32>
    %5 = vector.broadcast %4 : vector<32x1xf32> to vector<32x128xf32>
    %6 = arith.addf %3, %5 : vector<32x128xf32>
    %cst_6 = arith.constant 0.000000e+00 : f32
    %7 = vector.broadcast %cst_6 : f32 to vector<32x128xf32>
    %8 = arith.maximumf %6, %7 : vector<32x128xf32>
    %c0_7 = arith.constant 0 : index
    %c0_8 = arith.constant 0 : index
    %9 = vector.load %arg5[%c0_7, %c0_8] : memref<8x32xf32, #tpu.memory_space<vmem>>, vector<8x32xf32>
    %cst_9 = arith.constant dense<0.000000e+00> : vector<8x128xf32>
    %10 = tpu.matmul %9, %8, %cst_9 {dimension_numbers = #tpu.dot_dimension_numbers<[1], [0], [0], [1], [0, 0, 1, 1], [], []>} : vector<8x32xf32>, vector<32x128xf32>, vector<8x128xf32> -> vector<8x128xf32>
    %c0_10 = arith.constant 0 : index
    %c0_11 = arith.constant 0 : index
    %11 = vector.load %arg6[%c0_10, %c0_11] : memref<8x1xf32, #tpu.memory_space<vmem>>, vector<8x1xf32>
    %12 = vector.broadcast %11 : vector<8x1xf32> to vector<8x128xf32>
    %13 = arith.addf %10, %12 : vector<8x128xf32>
    %14 = tpu.iota {dimensions = array<i32: 0>} : vector<8x128xi32>
    %c0_i32 = arith.constant 0 : i32
    %15 = vector.broadcast %c0_i32 : i32 to vector<8x128xi32>
    %16 = arith.cmpi eq, %14, %15 : vector<8x128xi32>
    %c1_i32 = arith.constant 1 : i32
    %17 = vector.broadcast %c1_i32 : i32 to vector<8x128xi32>
    %18 = arith.cmpi eq, %14, %17 : vector<8x128xi32>
    %c2_i32 = arith.constant 2 : i32
    %19 = vector.broadcast %c2_i32 : i32 to vector<8x128xi32>
    %20 = arith.cmpi eq, %14, %19 : vector<8x128xi32>
    %cst_12 = arith.constant 2.000000e+00 : f32
    %cst_13 = arith.constant 0x7F800000 : f32
    %21 = vector.broadcast %cst_12 : f32 to vector<8x128xf32>
    %22 = vector.broadcast %cst_13 : f32 to vector<8x128xf32>
    %23 = arith.select %20, %21, %22 : vector<8x128xi1>, vector<8x128xf32>
    %cst_14 = arith.constant 3.000000e+00 : f32
    %24 = vector.broadcast %cst_14 : f32 to vector<8x128xf32>
    %25 = arith.select %18, %24, %23 : vector<8x128xi1>, vector<8x128xf32>
    %cst_15 = arith.constant 3.000000e+00 : f32
    %26 = vector.broadcast %cst_15 : f32 to vector<8x128xf32>
    %27 = arith.select %16, %26, %25 : vector<8x128xi1>, vector<8x128xf32>
    %28 = arith.cmpf ogt, %13, %27 : vector<8x128xf32>
    %29 = arith.select %28, %27, %13 : vector<8x128xi1>, vector<8x128xf32>
    %cst_16 = arith.constant 0.000000e+00 : f32
    %30 = vector.broadcast %cst_16 : f32 to vector<8x128xf32>
    %31 = arith.subf %30, %27 : vector<8x128xf32>
    %32 = arith.cmpf olt, %29, %31 : vector<8x128xf32>
    %cst_17 = arith.constant 0.000000e+00 : f32
    %33 = vector.broadcast %cst_17 : f32 to vector<8x128xf32>
    %34 = arith.subf %33, %27 : vector<8x128xf32>
    %35 = arith.select %32, %34, %29 : vector<8x128xi1>, vector<8x128xf32>
    %c0_18 = arith.constant 0 : index
    %c0_19 = arith.constant 0 : index
    %c0_20 = arith.constant 0 : index
    %36 = vector.load %arg1[%c0_18, %c0_19, %c0_20] : memref<1x8x128xf32, #tpu.memory_space<vmem>>, vector<1x8x128xf32>
    %37 = vector.shape_cast %36 : vector<1x8x128xf32> to vector<8x128xf32>
    %38 = arith.addf %37, %35 : vector<8x128xf32>
    %c0_21 = arith.constant 0 : index
    %c0_22 = arith.constant 0 : index
    %c0_23 = arith.constant 0 : index
    %39 = vector.load %arg7[%c0_21, %c0_22, %c0_23] : memref<1x8x128xf32, #tpu.memory_space<vmem>>, vector<1x8x128xf32>
    %40 = vector.shape_cast %39 : vector<1x8x128xf32> to vector<8x128xf32>
    %41 = vector.shape_cast %38 : vector<8x128xf32> to vector<1x8x128xf32>
    tpu.vector_store %arg7[%c0_21, %c0_22, %c0_23], %41 {strides = array<i32>} : memref<1x8x128xf32, #tpu.memory_space<vmem>>, vector<1x8x128xf32>,
    return
  }
  func.func @transform_0(%arg0: i32) -> (i32, i32, i32) {
    %c0_i32 = arith.constant 0 : i32
    %c0_i32_0 = arith.constant 0 : i32
    %c0_i32_1 = arith.constant 0 : i32
    return %arg0, %c0_i32, %c0_i32_0 : i32, i32, i32
  }
  func.func @transform_1(%arg0: i32) -> (i32, i32, i32) {
    %c0_i32 = arith.constant 0 : i32
    %c0_i32_0 = arith.constant 0 : i32
    %c0_i32_1 = arith.constant 0 : i32
    return %arg0, %c0_i32, %c0_i32_0 : i32, i32, i32
  }
  func.func @transform_2(%arg0: i32) -> (i32, i32) {
    %c0_i32 = arith.constant 0 : i32
    %c0_i32_0 = arith.constant 0 : i32
    %c0_i32_1 = arith.constant 0 : i32
    return %c0_i32, %c0_i32_0 : i32, i32
  }
  func.func @transform_3(%arg0: i32) -> (i32, i32) {
    %c0_i32 = arith.constant 0 : i32
    %c0_i32_0 = arith.constant 0 : i32
    %c0_i32_1 = arith.constant 0 : i32
    return %c0_i32, %c0_i32_0 : i32, i32
  }
  func.func @transform_4(%arg0: i32) -> (i32, i32) {
    %c0_i32 = arith.constant 0 : i32
    %c0_i32_0 = arith.constant 0 : i32
    %c0_i32_1 = arith.constant 0 : i32
    return %c0_i32, %c0_i32_0 : i32, i32
  }
  func.func @transform_5(%arg0: i32) -> (i32, i32) {
    %c0_i32 = arith.constant 0 : i32
    %c0_i32_0 = arith.constant 0 : i32
    %c0_i32_1 = arith.constant 0 : i32
    return %c0_i32, %c0_i32_0 : i32, i32
  }
  func.func @transform_6(%arg0: i32) -> (i32, i32, i32) {
    %c0_i32 = arith.constant 0 : i32
    %c0_i32_0 = arith.constant 0 : i32
    %c0_i32_1 = arith.constant 0 : i32
    return %arg0, %c0_i32, %c0_i32_0 : i32, i32, i32
  }
}

</mosaic_0001>

<bundles_post_ra>
// kernel: tpu_custom_call.1
= control target key start
LH: loop header
LB: loop body
LE: loop exit
PB: predicated region body
PF: predicated region fallthrough
CT: control target
= control target key end

     0   :  { %11 = vsyncpa [#allocation3], 0  ;;  %s933_s0 = inlined_call_operand.vmem [shape: f32[2,8,128], index: 0, kind: input, shape index: {}]   ;;  %s934_s1 = inlined_call_operand.vmem [shape: f32[2,16,128], index: 1, kind: input, shape index: {}]   ;;  %s935_s2 = inlined_call_operand.vmem [shape: f32[32,16], index: 2, kind: input, shape index: {}]   ;;  %s936_s3 = inlined_call_operand.vmem [shape: f32[32,1], index: 3, kind: input, shape index: {}]   ;;  %s937_s4 = inlined_call_operand.vmem [shape: f32[8,32], index: 4, kind: input, shape index: {}]   ;;  %s938_s5 = inlined_call_operand.vmem [shape: f32[8,1], index: 5, kind: input, shape index: {}]   ;;  %s939_s6 = inlined_call_operand.hbm [shape: f32[2,8,128], index: 6, kind: output, shape index: {}]  }
   0x1   :  { %13 = vsyncpa [#allocation3 + $0x1], 0  ;;  %s792_s21 = smov 0   ;;  %s794_s22 = smov 0  }
   0x2   :  { %s796_s23 = smov 0   ;;  %s798_s24 = smov 0  }
   0x3 LB: > { %s813_s25 = sadd.s32 4294967295, %s749_s24   ;;  %s581_s26 = sadd.s32 4294967294, %s749_s24   ;;  %s749_s24 = sphi %s798_s24, %s945_s24   ;;  %s745_s23 = sphi %s796_s23, %s944_s23   ;;  %s741_s22 = sphi %s794_s22, %s943_s22   ;;  %s737_s21 = sphi %s792_s21, %s942_s21  }
   0x4   : > { %s817_s27 = sadd.s32 1, %s749_s24   ;;  %s162_s28 = sadd.s32 1, %s745_s23 }
   0x5   : > { %s159_s29 = ssub.s32 %s749_s24, %s817_s27  ;;  %p172_p0 = scmp.ne.s32.totalorder %s745_s23, %s741_s22 }
   0x6   : > { %p160_p1 = scmp.eq.s32.totalorder %s159_s29, 0  ;;  %p173_p2 = scmp.eq.s32.totalorder %s813_s25, 1 }
   0x7   : > { %p178_p3 = scmp.ne.s32.totalorder %s741_s22, %s737_s21  ;;  %p179_p4 = scmp.eq.s32.totalorder %s581_s26, 1 }
   0x8   : > { %s828_s30 = scalar_select %p160_p1, %s745_s23, %s162_s28  }
   0x9   : > { %p830_p5 = por %p173_p2, %p172_p0  ;;  %p834_p6 = por %p179_p4, %p178_p3 }
   0xa   : > { %p584_p7 = scmp.ge.s32.totalorder %s749_s24, 1  ;;  %p224_p8 = scmp.lt.s32.totalorder %s749_s24, 3 }
   0xc   : > { %p225_p9 = pnand %p584_p7, %p224_p8 }
   0xd   : > { %p258_p10 = scmp.lt.s32.totalorder (!%p225_p9), %s813_s25, 1  ;;  %v269_v0 = vld [vmem:[%s935_s2] sm:$0xff] (!%p225_p9)  ;;  %vm297_vm0 = vcmask (!%p225_p9), 130048   ;;  %v751_v1 = vmov (!%p225_p9), 0   ;;  %v275_v3 = vld [vmem:[%s936_s3 + $0x10] sm:$0xff] (!%p225_p9)  ;;  %v274_v4 = vld [vmem:[%s936_s3 + $0x8] sm:$0xff] (!%p225_p9)  ;;  %v480_v34 = vlaneseq (!%p225_p9) }
   0xe   : > { %228 = sbr.rel (%p225_p9) target bundleno = 492 (0x1ec), region = 44  ;;  %614 = vmatprep.mubr.msk.f32.mxu0 (!%p225_p9), %vm297_vm0, %v269_v0  ;;  %685 = vset.pattern.permute.xlu0 (!%p225_p9), %v751_v1  ;;  %v273_v2 = vld [vmem:[%s936_s3] sm:$0xff] (!%p225_p9)  ;;  %v276_v5 = vld [vmem:[%s936_s3 + $0x18] sm:$0xff] (!%p225_p9)  ;;  %v270_v10 = vld [vmem:[%s935_s2 + $0x8] sm:$0xff] (!%p225_p9)  ;;  %v752_v13 = vmov (!%p225_p9), 0.0|0.0   ;;  %vm753_vm1 = vmmov (!%p225_p9), 0  }
   0xf   : > { %279 = vperm.xlu0 (!%p225_p9), %685, %v273_v2   ;;  %686 = vset.pattern.permute.xlu1 (!%p225_p9), %v751_v1  ;;  %v400_v9 = vld [vmem:[%s938_s5] sm:$0xff] (!%p225_p9)  ;;  %v271_v11 = vld [vmem:[%s935_s2 + $0x10] sm:$0xff] (!%p225_p9)  ;;  %v272_v12 = vld [vmem:[%s935_s2 + $0x18] sm:$0xff] (!%p225_p9)  ;;  %v754_v14 = vmov (!%p225_p9), 0.0   ;;  %vm406_vm2 = vcmask (!%p225_p9), 261120   ;;  %v481_v35 = vshrl.u32 (!%p225_p9), %v480_v34, 7 }
  0x10   : > { %289 = vperm.xlu1 (!%p225_p9), %686, %v275_v3   ;;  %635 = vmatprep.subr.bf16.mxu1 (!%p225_p9), %v752_v13  ;;  %v399_v33 = vld [vmem:[%s937_s4] sm:$0xff] (!%p225_p9)  ;;  %v755_v36 = vmov (!%p225_p9), inf   ;;  %s255_s20 = sand.u32 (!%p225_p9), 1, %s741_s22   ;;  %s595_s11 = sshll.u32 (!%p225_p9), %s813_s25, 7 }
  0x11   : > { %628 = vmatprep.mubr.msk.f32.mxu1 (!%p225_p9), %vm753_vm1, %v754_v14  ;;  %vm484_vm3 = vcmp.eq.s32.totalorder (!%p225_p9), %v481_v35, 2  ;;  %vm483_vm4 = vcmp.eq.s32.totalorder (!%p225_p9), %v481_v35, 1  ;;  %vm482_vm5 = vcmp.eq.s32.totalorder (!%p225_p9), %v481_v35, 0  ;;  %s585_s26 = sshll.u32 (!%p225_p9), %s255_s20, 3  ;;  %s891_s16 = scalar_lea.hbm (!%p225_p9), %s939_s6, %s595_s11 }
  0x12   : > { %v485_v37 = vsel (!%p225_p9), %vm484_vm3, 2.0, %v755_v36  ;;  %s257_s12 = scalar_lea.vmem (!%p225_p9), [#allocation2], %s585_s26  ;;  %s497_s17 = scalar_lea.sflag (!%p225_p9), [#allocation3], %s255_s20 }
  0x13   : > { %284 = vperm.xlu0 (!%p225_p9), %685, %v274_v4   ;;  %v486_v38 = vsel (!%p225_p9), %vm483_vm4, 3.0, %v485_v37  ;;  %s510_s14 = sshll.u32 (!%p225_p9), %s257_s12, 4  ;;  %s893_s14 = int_to_ptr.vmem [resolvable:$true] %s510_s14 }
  0x14   : > { %294 = vperm.xlu1 (!%p225_p9), %686, %v276_v5   ;;  %v487_v39 = vsel (!%p225_p9), %vm482_vm5, 3.0, %v486_v38 }
  0x15   : > { %s849_s13 = scalar_select %p258_p10, %s813_s25, 1  ;;  %v490_v43 = vsub.f32 0.0, %v487_v39 }
  0x16   : > { %s756_s25 = smov [#allocation2]  }
  0x17   : > { %s598_s18 = sshll.u32 %s849_s13, 4  ;;  %403 = vperm.xlu0 %685, %v400_v9   ;;  %s586_s28 = sshll.u32 %s849_s13, 3 }
  0x18   : > { %s266_s29 = scalar_lea.vmem %s934_s1, %s598_s18  ;;  %s261_s10 = scalar_lea.vmem %s933_s0, %s586_s28 }
  0x19   : > { %v267_v6 = vld [vmem:[%s266_s29] sm:$0xff]  ;;  %v268_v7 = vld [vmem:[%s266_s29 + $0x8] sm:$0xff]  ;;  %s687_s18 = scalar_lea.vmem %s893_s14, 128  ;;  %s691_s19 = sshll.u32 %s756_s25, 4  ;;  %s692_s19 = int_to_ptr.vmem [resolvable:$false] %s691_s19 }
  0x1a   : > { %v631_v8 = vpack.c.bf16 %v268_v7, %v267_v6  ;;  %v493_v46 = vld [vmem:[%s261_s10] sm:$0xff]  ;;  %p688_p11 = scmp.ne.s32.totalorder %s893_s14, %s687_s18  ;;  %s693_s26 = scalar_lea.vmem %s692_s19, 256 }
  0x1b   : > { %p694_p0 = scmp.lt.s32.totalorder %s893_s14, %s692_s19  ;;  %p695_p1 = scmp.lt.s32.totalorder %s693_s26, %s687_s18 }
  0x1c   : > { %632 = vmatprep.subr.bf16.mxu0 %v631_v8  ;;  %p689_p12 = pnand %p688_p11, %p830_p5 }
  0x1d   : > { %634 = vmatpush3.bf16.msra.mxu0 %v631_v8  ;;  %p696_p2 = por %p695_p1, %p694_p0 }
  0x1e   : > { %p690_p13 = pneg %p689_p12 }
  0x20   : > { %615 = vmatmul.mubr.msk.f32.vlgmr.msra.gmra.mrb[0].mxu0 %vm297_vm0, %v270_v10  ;;  %p697_p3 = pnand %p696_p2, %p690_p13 }
  0x21   : > { %617 = vmatprep.mubr.msk.f32.mxu0 %vm297_vm0, %v271_v11 }
  0x24   : > { %618 = vmatmul.mubr.msk.f32.gmra.mrb[2].mxu0 %vm297_vm0, %v272_v12 }
  0x8e   : > { %v280_v15 = vpop.permute.xlu0 %279 }
  0x8f   : > { %v290_v16 = vpop.permute.xlu1 %289 }
  0x92   : > { %v285_v17 = vpop.permute.xlu0 %284 }
  0x93   : > { %v295_v23 = vpop.permute.xlu1 %294 }
  0x96   : > { %v404_v40 = vpop.permute.xlu0 %403 }
  0xf3   : > { %v616_v18 = vpop.f32.mrb[0].mxu0 }
  0xf4   : > { %v382_v19 = vadd.f32 %v616_v18, %v285_v17  ;;  %v376_v20 = vpop.f32.mrb[1].mxu0 }
  0xf5   : > { %v377_v21 = vadd.f32 %v376_v20, %v280_v15 }
  0xf6   : > { %v396_v22 = vmax.f32 %v382_v19, 0.0 }
  0xf7   : > { %v395_v24 = vmax.f32 %v377_v21, 0.0  ;;  %v619_v25 = vpop.f32.mrb[2].mxu0 }
  0xf8   : > { %v392_v26 = vadd.f32 %v619_v25, %v295_v23  ;;  %v386_v27 = vpop.f32.mrb[3].mxu0 }
  0xf9   : > { %v387_v28 = vadd.f32 %v386_v27, %v290_v16  ;;  %v636_v29 = vpack.c.bf16 %v396_v22, %v395_v24 }
  0xfa   : > { %v398_v30 = vmax.f32 %v392_v26, 0.0 }
  0xfb   : > { %v397_v31 = vmax.f32 %v387_v28, 0.0  ;;  %637 = vmatpush3.bf16.msra.mxu1 %v636_v29 }
  0xfc   : > { %638 = vmatprep.subr.bf16.mxu1 %v752_v13 }
  0xfd   : > { %v639_v32 = vpack.c.bf16 %v398_v30, %v397_v31 }
  0xff   : > { %640 = vmatpush3.bf16.msra.mxu1 %v639_v32 }
 0x102   : > { %629 = vmatmul.mubr.msk.f32.vlgmr.msra.gmra.mrb[0].mxu1 %vm406_vm2, %v399_v33 }
 0x1d5   : > { %v476_v41 = vpop.f32.mrb[0].mxu1 }
 0x1d6   : > { %v477_v42 = vadd.f32 %v476_v41, %v404_v40  ;;  %v630_v44 = vpop.f32.mrb[1].mxu1 }
 0x1d8   : > { %vm488_vm6 = vcmp.gt.f32.partialorder %v477_v42, %v487_v39 }
 0x1d9   : > { %v489_v45 = vsel %vm488_vm6, %v487_v39, %v477_v42 }
 0x1da   : > { %vm491_vm7 = vcmp.lt.f32.partialorder %v489_v45, %v490_v43 }
 0x1db   : > { %v492_v47 = vsel %vm491_vm7, %v490_v43, %v489_v45 }
 0x1dc   : > { %v494_v48 = vadd.f32 %v493_v46, %v492_v47 }
 0x1de   : > { %495 = vst [vmem:[%s257_s12] sm:$0xff] %v494_v48 }
 0x1df   : > { %700 = shalt.err (!%p697_p3)
}
 0x1e0   : > { %s701_s20 = scalar_lea.hbm %s891_s16, 128  ;;  %s705_s9 = scalar_lea.hbm %s939_s6, 256 }
 0x1e1   : > { %p702_p4 = scmp.ne.s32.totalorder %s891_s16, %s701_s20  ;;  %p706_p9 = scmp.lt.u32.totalorder %s891_s16, %s939_s6 }
 0x1e2   : > { %p707_p10 = scmp.lt.u32.totalorder %s705_s9, %s701_s20  ;;  %p709_p12 = scmp.lt.u32.totalorder %s701_s20, %s891_s16 }
 0x1e3   : > { %p703_p7 = pnand %p702_p4, %p830_p5 }
 0x1e4   : > { %p708_p11 = por %p707_p10, %p706_p9 }
 0x1e5   : > { %p704_p8 = pneg %p703_p7 }
 0x1e6   : > { %p710_p13 = por %p709_p12, %p708_p11 }
 0x1e8   : > { %p711_p0 = pnand %p710_p13, %p704_p8 }
 0x1ea   : > { %714 = shalt.err (!%p711_p0)
}
 0x1eb   : > { %641 = dma.vmem_to_hbm [thread:$0]  (%p830_p5), %s893_s14, 128, %s891_s16, %s497_s17  }
 0x1ec PF: > { %p647_p1 = scmp.ge.s32.totalorder %s749_s24, 2  ;;  %s522_s12 = sand.u32 1, %s737_s21  }
 0x1ed   : > { %s523_s13 = scalar_lea.sflag [#allocation3], %s522_s12 }
 0x1ee   : > { %p644_p2 = pnand %p647_p1, %p834_p6 }
 0x1f0   : > { %732 = dma.done.wait (!%p644_p2), %s523_s13, 128  }
 0x1f1   : > { %734 = vsyncadd (!%p644_p2), %s523_s13, 4294967168  ;;  %p16_p3 = scmp.ge.s32.totalorder %s817_s27, 4   ;;  %s942_s21 = smov %s741_s22 }
 0x1f2   : > { %s943_s22 = smov %s745_s23  ;;  %s944_s23 = smov %s828_s30 }
 0x1f3   : > { %s945_s24 = smov %s817_s27  ;;  %18 = sbr.rel (!%p16_p3) target bundleno = 3 (0x3), region = 82 }
 0x1fa   :  { %528 = vsyncpa [#allocation3], 1 }
 0x1fb   :  { %530 = vsyncpa [#allocation3 + $0x1], 1 }

</bundles_post_ra>
